<compile_context>
chip_gen: v7x
topology: tpu7x:2x2x1
jax: 0.10.0
libtpu: 0.0.40
codegen_flags: <defaults>
</compile_context>

<pallas_src>
import jax
import jax.numpy as jnp
from jax.experimental import pallas as pl
from jax.experimental.pallas import tpu as pltpu


def _contrast_kernel(x_ref, o_ref):
    # x_ref block: (C*H, WT) for one batch element / one W tile.
    x = x_ref[...]                          # keep input dtype (bf16 stays bf16)
    xf = x.astype(jnp.float32)              # no-op for f32 inputs
    # One-pass statistics over the (C*H) sublane axis.
    inv_n = jnp.float32(1.0 / x.shape[0])
    s1 = jnp.sum(xf, axis=0, keepdims=True) * inv_n            # E[x]      (1, WT)
    s2 = jnp.sum(xf * xf, axis=0, keepdims=True) * inv_n       # E[x^2]    (1, WT)
    var = jnp.maximum(s2 - s1 * s1, 0.0)    # clamp: cancellation can dip < 0
    std = jnp.sqrt(var)                     # contrast_vector, (1, WT)
    # Scale in the input dtype (halves vreg / store traffic for bf16 inputs).
    o_ref[...] = (std.astype(x.dtype) * x).astype(o_ref.dtype)


def _choose_w_tile(ch, w):
    """Largest lane-dense W tile whose f32-sized block fits ~8 MiB/buffer."""
    if w <= 128:
        # Full-dim block (allowed even when W is not a multiple of 128).
        return w
    budget = 8 << 20                                     # per-buffer budget
    by_budget = max(128, (budget // (ch * 4)) // 128 * 128)
    return min(512, by_budget, pl.cdiv(w, 128) * 128)


def layer_contrast(x):
    """x: (B, C, H, W) NCHW float array -> (B, C, H, W)."""
    B, C, H, W = x.shape
    CH = C * H
    x2 = x.reshape(B, CH, W)

    wt = _choose_w_tile(CH, W)
    grid = (B, pl.cdiv(W, wt))

    block_bytes = CH * wt * x.dtype.itemsize
    # in + out, double-buffered (4 buffers) + headroom; clamp below v7x's
    # 64 MiB physical VMEM.
    vmem_limit = int(min(max(48 << 20, 6 * block_bytes), 64 << 20))

    out = pl.pallas_call(
        _contrast_kernel,
        out_shape=jax.ShapeDtypeStruct((B, CH, W), x.dtype),
        grid=grid,
        in_specs=[pl.BlockSpec((None, CH, wt), lambda b, w: (b, 0, w))],
        out_specs=pl.BlockSpec((None, CH, wt), lambda b, w: (b, 0, w)),
        compiler_params=pltpu.CompilerParams(
            dimension_semantics=("parallel", "parallel"),
            vmem_limit_bytes=vmem_limit),
    )(x2)
    return out.reshape(B, C, H, W)


def _reference(x):
    # Pure-JAX mirror of the PyTorch forward for verification.
    mean_vector = jnp.mean(x, axis=(1, 2), keepdims=True)
    feature_contrast = jnp.sqrt(
        jnp.mean((x - mean_vector) ** 2, axis=(1, 2), keepdims=True))
    contrast_vector = jnp.mean(feature_contrast, axis=(1, 2), keepdims=True)
    return contrast_vector * x


if __name__ == "__main__":
    # Small NCHW test (W < 128 -> full-width block path).
    x = jax.random.normal(jax.random.PRNGKey(0), (2, 4, 16, 16),
                          dtype=jnp.float32)
    out = jax.block_until_ready(layer_contrast(x))
    ref = jax.block_until_ready(_reference(x))
    assert out.shape == x.shape
    assert jnp.allclose(out, ref, atol=1e-5, rtol=1e-5), (
        f"max abs err {jnp.max(jnp.abs(out - ref))}")

    # Wider test (exercises the lane-dense W-tiled path).
    x2 = jax.random.normal(jax.random.PRNGKey(1), (2, 4, 8, 256),
                           dtype=jnp.float32)
    out2 = jax.block_until_ready(layer_contrast(x2))
    ref2 = jax.block_until_ready(_reference(x2))
    assert out2.shape == x2.shape
    assert jnp.allclose(out2, ref2, atol=1e-5, rtol=1e-5), (
        f"max abs err {jnp.max(jnp.abs(out2 - ref2))}")

    print("KERNEL_OK")
</pallas_src>

<mosaic_0001>
module attributes {stable_mosaic.version = 11 : i64} {
  func.func @_contrast_kernel(%arg0: i32, %arg1: i32, %arg2: memref<1x64x16xf32, #tpu.memory_space<vmem>>, %arg3: memref<1x64x16xf32, #tpu.memory_space<vmem>>) attributes {dimension_semantics = [#tpu.dimension_semantics<parallel>, #tpu.dimension_semantics<parallel>], iteration_bounds = array<i64: 2, 1>, scalar_prefetch = 0 : i64, scratch_operands = 0 : i64, tpu.core_type = #tpu.core_type<tc>, window_params = [{transform_indices = @transform_0, window_bounds = array<i64: 1, 64, 16>}, {transform_indices = @transform_1, window_bounds = array<i64: 1, 64, 16>}]} {
    %c0 = arith.constant 0 : index
    %c0_0 = arith.constant 0 : index
    %c0_1 = arith.constant 0 : index
    %0 = vector.load %arg2[%c0, %c0_0, %c0_1] : memref<1x64x16xf32, #tpu.memory_space<vmem>>, vector<1x64x16xf32>
    %1 = vector.shape_cast %0 : vector<1x64x16xf32> to vector<64x16xf32>
    %cst = arith.constant dense<0.000000e+00> : vector<16xf32>
    %2 = vector.multi_reduction <add>, %1, %cst [0] : vector<64x16xf32> to vector<16xf32>
    %3 = vector.shape_cast %2 : vector<16xf32> to vector<1x16xf32>
    %cst_2 = arith.constant 1.562500e-02 : f32
    %4 = vector.broadcast %cst_2 : f32 to vector<1x16xf32>
    %5 = arith.mulf %3, %4 : vector<1x16xf32>
    %6 = arith.mulf %1, %1 : vector<64x16xf32>
    %cst_3 = arith.constant dense<0.000000e+00> : vector<16xf32>
    %7 = vector.multi_reduction <add>, %6, %cst_3 [0] : vector<64x16xf32> to vector<16xf32>
    %8 = vector.shape_cast %7 : vector<16xf32> to vector<1x16xf32>
    %cst_4 = arith.constant 1.562500e-02 : f32
    %9 = vector.broadcast %cst_4 : f32 to vector<1x16xf32>
    %10 = arith.mulf %8, %9 : vector<1x16xf32>
    %11 = arith.mulf %5, %5 : vector<1x16xf32>
    %12 = arith.subf %10, %11 : vector<1x16xf32>
    %cst_5 = arith.constant 0.000000e+00 : f32
    %13 = vector.broadcast %cst_5 : f32 to vector<1x16xf32>
    %14 = arith.maximumf %12, %13 : vector<1x16xf32>
    %15 = math.sqrt %14 : vector<1x16xf32>
    %16 = vector.broadcast %15 : vector<1x16xf32> to vector<64x16xf32>
    %17 = arith.mulf %16, %1 : vector<64x16xf32>
    %c0_6 = arith.constant 0 : index
    %c0_7 = arith.constant 0 : index
    %c0_8 = arith.constant 0 : index
    %18 = vector.load %arg3[%c0_6, %c0_7, %c0_8] : memref<1x64x16xf32, #tpu.memory_space<vmem>>, vector<1x64x16xf32>
    %19 = vector.shape_cast %18 : vector<1x64x16xf32> to vector<64x16xf32>
    %20 = vector.shape_cast %17 : vector<64x16xf32> to vector<1x64x16xf32>
    tpu.vector_store %arg3[%c0_6, %c0_7, %c0_8], %20 {strides = array<i32>} : memref<1x64x16xf32, #tpu.memory_space<vmem>>, vector<1x64x16xf32>,
    return
  }
  func.func @transform_0(%arg0: i32, %arg1: i32) -> (i32, i32, i32) {
    %c0_i32 = arith.constant 0 : i32
    %c0_i32_0 = arith.constant 0 : i32
    return %arg0, %c0_i32, %arg1 : i32, i32, i32
  }
  func.func @transform_1(%arg0: i32, %arg1: i32) -> (i32, i32, i32) {
    %c0_i32 = arith.constant 0 : i32
    %c0_i32_0 = arith.constant 0 : i32
    return %arg0, %c0_i32, %arg1 : i32, i32, i32
  }
}

</mosaic_0001>

<bundles_post_ra>
// kernel: tpu_custom_call.1
= control target key start
LH: loop header
LB: loop body
LE: loop exit
PB: predicated region body
PF: predicated region fallthrough
CT: control target
= control target key end

     0   :  { %s391_s6 = smov 0   ;;  %s393_s7 = smov 0   ;;  %s491_s0 = inlined_call_operand.vmem [shape: f32[2,64,16], index: 0, kind: input, shape index: {}]   ;;  %s492_s1 = inlined_call_operand.vmem [shape: f32[2,64,16], index: 1, kind: output, shape index: {}]  }
   0x1   :  { %s395_s8 = smov 0  }
   0x2 LB: > { %s23_s9 = sadd.s32 1, %s375_s7  ;;  %p322_p0 = scmp.ge.s32.totalorder %s379_s8, 1  ;;  %s379_s8 = sphi %s395_s8, %s11_s8   ;;  %s375_s7 = sphi %s393_s7, %s494_s7   ;;  %s371_s6 = sphi %s391_s6, %s493_s6  }
   0x3   : > { %p25_p1 = scmp.ge.s32.totalorder %s23_s9, 2  ;;  %p106_p2 = scmp.lt.s32.totalorder %s379_s8, 3 }
   0x5   : > { %s496_s9 = smov (%p25_p1, %s23_s9), 0  ;;  %p107_p3 = pnand %p322_p0, %p106_p2 }
   0x6   : > { %p132_p4 = scmp.lt.s32.totalorder (!%p107_p3), %s371_s6, 1  ;;  %vm156_vm0 = vcmask (!%p107_p3), 130048  }
   0x7   : > { %110 = sbr.rel (%p107_p3) target bundleno = 75 (0x4b), region = 24 }
   0xe   : > { %s498_s6 = smov (!%p132_p4, %s371_s6), 1 }
   0xf   : > { %s329_s10 = sshll.u32 %s498_s6, 6 }
  0x10   : > { %s139_s13 = scalar_lea.vmem %s491_s0, %s329_s10  ;;  %s147_s16 = scalar_lea.vmem %s492_s1, %s329_s10 }
  0x11   : > { %v417_v0 = vld [vmem:[%s139_s13] sm:$0xff]  ;;  %v419_v1 = vld [vmem:[%s139_s13 + $0x8] sm:$0xff]  ;;  %v421_v2 = vld [vmem:[%s139_s13 + $0x10] sm:$0xff] }
  0x12   : > { %v423_v3 = vld [vmem:[%s139_s13 + $0x18] sm:$0xff]  ;;  %v157_v4 = vsel %vm156_vm0, %v417_v0, 0.0  ;;  %v158_v5 = vsel %vm156_vm0, %v419_v1, 0.0  ;;  %v160_v6 = vsel %vm156_vm0, %v421_v2, 0.0  ;;  %v179_v7 = vmul.f32 %v417_v0, %v417_v0  ;;  %v433_v8 = vld [vmem:[%s139_s13 + $0x20] sm:$0xff]  ;;  %v441_v13 = vld [vmem:[%s139_s13 + $0x28] sm:$0xff] }
  0x13   : > { %v159_v9 = vadd.f32 %v158_v5, %v157_v4  ;;  %v162_v10 = vsel %vm156_vm0, %v423_v3, 0.0  ;;  %v180_v11 = vmul.f32 %v419_v1, %v419_v1  ;;  %v181_v12 = vmul.f32 %v421_v2, %v421_v2  ;;  %v154_v20 = vld [vmem:[%s139_s13 + $0x30] sm:$0xff]  ;;  %v155_v27 = vld [vmem:[%s139_s13 + $0x38] sm:$0xff] }
  0x14   : > { %v182_v15 = vmul.f32 %v423_v3, %v423_v3  ;;  %v164_v16 = vsel %vm156_vm0, %v433_v8, 0.0  ;;  %v183_v17 = vmul.f32 %v433_v8, %v433_v8  ;;  %v187_v18 = vsel %vm156_vm0, %v179_v7, 0.0 }
  0x15   : > { %v161_v14 = vadd.f32 %v160_v6, %v159_v9  ;;  %v188_v19 = vsel %vm156_vm0, %v180_v11, 0.0  ;;  %v190_v23 = vsel %vm156_vm0, %v181_v12, 0.0  ;;  %v166_v24 = vsel %vm156_vm0, %v441_v13, 0.0 }
  0x16   : > { %v189_v22 = vadd.f32 %v188_v19, %v187_v18  ;;  %v184_v25 = vmul.f32 %v441_v13, %v441_v13  ;;  %v192_v26 = vsel %vm156_vm0, %v182_v15, 0.0  ;;  %v168_v30 = vsel %vm156_vm0, %v154_v20, 0.0 }
  0x17   : > { %v163_v21 = vadd.f32 %v162_v10, %v161_v14  ;;  %v185_v31 = vmul.f32 %v154_v20, %v154_v20  ;;  %v194_v32 = vsel %vm156_vm0, %v183_v17, 0.0  ;;  %v170_v35 = vsel %vm156_vm0, %v155_v27, 0.0 }
  0x18   : > { %v191_v29 = vadd.f32 %v190_v23, %v189_v22  ;;  %v186_v36 = vmul.f32 %v155_v27, %v155_v27  ;;  %v196_v37 = vsel %vm156_vm0, %v184_v25, 0.0 }
  0x19   : > { %v165_v28 = vadd.f32 %v164_v16, %v163_v21  ;;  %v198_v40 = vsel %vm156_vm0, %v185_v31, 0.0 }
  0x1a   : > { %v193_v34 = vadd.f32 %v192_v26, %v191_v29  ;;  %v200_v43 = vsel %vm156_vm0, %v186_v36, 0.0 }
  0x1b   : > { %v167_v33 = vadd.f32 %v166_v24, %v165_v28 }
  0x1c   : > { %v195_v39 = vadd.f32 %v194_v32, %v193_v34 }
  0x1d   : > { %v169_v38 = vadd.f32 %v168_v30, %v167_v33 }
  0x1e   : > { %v197_v42 = vadd.f32 %v196_v37, %v195_v39 }
  0x1f   : > { %v171_v41 = vadd.f32 %v170_v35, %v169_v38 }
  0x20   : > { %v199_v45 = vadd.f32 %v198_v40, %v197_v42 }
  0x21   : > { %v172_v44 = vrot.slane %v171_v41, 4 }
  0x22   : > { %v201_v47 = vadd.f32 %v200_v43, %v199_v45 }
  0x23   : > { %v173_v46 = vadd.f32 %v172_v44, %v171_v41 }
  0x24   : > { %v202_v49 = vrot.slane %v201_v47, 4 }
  0x25   : > { %v174_v48 = vrot.slane %v173_v46, 2 }
  0x26   : > { %v203_v51 = vadd.f32 %v202_v49, %v201_v47 }
  0x27   : > { %v175_v50 = vadd.f32 %v174_v48, %v173_v46 }
  0x28   : > { %v204_v53 = vrot.slane %v203_v51, 2 }
  0x29   : > { %v176_v52 = vrot.slane %v175_v50, 1 }
  0x2a   : > { %v205_v55 = vadd.f32 %v204_v53, %v203_v51 }
  0x2b   : > { %v177_v54 = vadd.f32 %v176_v52, %v175_v50 }
  0x2c   : > { %v206_v57 = vrot.slane %v205_v55, 1 }
  0x2d   : > { %v178_v56 = vmul.f32 0.015625, %v177_v54 }
  0x2e   : > { %v207_v58 = vadd.f32 %v206_v57, %v205_v55 }
  0x2f   : > { %v209_v59 = vmul.f32 %v178_v56, %v178_v56 }
  0x30   : > { %v208_v60 = vmul.f32 0.015625, %v207_v58 }
  0x32   : > { %v210_v61 = vsub.f32 %v208_v60, %v209_v59 }
  0x34   : > { %v211_v62 = vmax.f32 %v210_v61, 0.0 }
  0x36   : > { %355 = vrsqrt.f32 %v211_v62  ;;  %vm214_vm1 = vcmp.eq.f32.partialorder %v211_v62, inf  ;;  %v217_v4 = vand.u32 2147483648, %v211_v62  ;;  %vm216_vm2 = vcmp.eq.f32.partialorder %v211_v62, 0.0 }
  0x40   : > { %v356_v63 = vpop.eup %355 }
  0x41   : > { %v213_v5 = vmul.f32 %v356_v63, %v211_v62 }
  0x43   : > { %v215_v6 = vsel %vm214_vm1, %v211_v62, %v213_v5 }
  0x44   : > { %v218_v7 = vsel %vm216_vm2, %v217_v4, %v215_v6 }
  0x45   : > { %v219_v9 = vmul.f32 %v218_v7, %v417_v0  ;;  %v220_v10 = vmul.f32 %v218_v7, %v419_v1  ;;  %v221_v11 = vmul.f32 %v218_v7, %v421_v2  ;;  %v222_v12 = vmul.f32 %v218_v7, %v423_v3 }
  0x46   : > { %v223_v14 = vmul.f32 %v218_v7, %v433_v8  ;;  %v224_v15 = vmul.f32 %v218_v7, %v441_v13  ;;  %v225_v16 = vmul.f32 %v218_v7, %v154_v20  ;;  %v226_v17 = vmul.f32 %v218_v7, %v155_v27 }
  0x47   : > { %227 = vst.msk [vmem:[%s147_s16] sm:$0xff] %vm156_vm0, %v219_v9  ;;  %228 = vst.msk [vmem:[%s147_s16 + $0x8] sm:$0xff] %vm156_vm0, %v220_v10 }
  0x48   : > { %229 = vst.msk [vmem:[%s147_s16 + $0x10] sm:$0xff] %vm156_vm0, %v221_v11  ;;  %230 = vst.msk [vmem:[%s147_s16 + $0x18] sm:$0xff] %vm156_vm0, %v222_v12 }
  0x49   : > { %231 = vst.msk [vmem:[%s147_s16 + $0x20] sm:$0xff] %vm156_vm0, %v223_v14  ;;  %232 = vst.msk [vmem:[%s147_s16 + $0x28] sm:$0xff] %vm156_vm0, %v224_v15 }
  0x4a   : > { %233 = vst.msk [vmem:[%s147_s16 + $0x30] sm:$0xff] %vm156_vm0, %v225_v16  ;;  %234 = vst.msk [vmem:[%s147_s16 + $0x38] sm:$0xff] %vm156_vm0, %v226_v17 }
  0x4b PF: > { %s11_s8 = sadd.s32 1, %s379_s8   ;;  %s493_s6 = smov %s375_s7 }
  0x4c   : > { %p8_p5 = scmp.ge.s32.totalorder %s11_s8, 4   ;;  %s494_s7 = smov %s496_s9 }
  0x4e   :  { %10 = sbr.rel (!%p8_p5) target bundleno = 2 (0x2), region = 54 }

</bundles_post_ra>
